<compile_context>
chip_gen: v6e
topology: v6e:2x2x1
jax: 0.10.0
libtpu: 0.0.40
codegen_flags: <defaults>
</compile_context>

<pallas_src>
import functools

import numpy as np
import jax
import jax.numpy as jnp
from jax.experimental import pallas as pl
from jax.experimental.pallas import tpu as pltpu


def build_positional_embedding(input_size: int, max_len: int = 5000) -> jnp.ndarray:
    """Reference sinusoidal table, identical to the PyTorch __init__ (C assumed even,
    matching the original module; odd C is a latent bug in the PyTorch code too)."""
    idx = 1.0 / (10000.0 ** (jnp.arange(0, input_size, 2, dtype=jnp.float32)
                             / float(input_size)))
    pos = jnp.arange(0, max_len, dtype=jnp.float32).reshape(max_len, 1)
    emb = jnp.zeros((max_len, input_size), dtype=jnp.float32)
    emb = emb.at[:, 0::2].set(jnp.sin(pos * idx))
    emb = emb.at[:, 1::2].set(jnp.cos(pos * idx))
    return emb  # (max_len, C)


def _choose_k(T: int, C: int) -> int:
    """How many consecutive time steps to pack into one flattened (lane-dense) row."""
    divisors = [d for d in range(1, T + 1) if T % d == 0]
    lane_dense = [d for d in divisors if (d * C) % 128 == 0 and d * C <= 4096]
    if lane_dense:
        preferred = [d for d in lane_dense if d * C >= 512]
        return min(preferred) if preferred else max(lane_dense)
    fallback = [d for d in divisors if d * C <= 4096]
    return max(fallback) if fallback else 1


def _pe_add_kernel(x_ref, aux_ref, o_ref, *, k, tile_rows):
    # x_ref / o_ref : (1, tile_rows, L) with L = k*C   (one lane-dense slab)
    # aux_ref       : (2, 1, L) = [a, b] such that pe = sin((chunk*k) * a + b)
    rt0 = pl.program_id(1) * tile_rows                      # first sequence-chunk here
    row = jax.lax.broadcasted_iota(jnp.int32, x_ref.shape, 1) + rt0
    t = row.astype(jnp.float32) * np.float32(k)             # absolute time of lane group
    aux = aux_ref[...]
    a = aux[0]                                              # (1, L) per-lane frequency
    b = aux[1]                                              # (1, L) per-lane offset
    pe = jnp.sin(t * a + b)                                 # EUP slot; rest of kernel is VPU
    o_ref[...] = (x_ref[...].astype(jnp.float32) + pe).astype(o_ref.dtype)


def positional_encoding_forward(x: jnp.ndarray, max_len: int = 5000) -> jnp.ndarray:
    """x: (B, T, C).  Returns x + sinusoidal_embedding[:T] (broadcast over batch)."""
    B, T, C = x.shape
    if T > max_len:
        raise ValueError(f"sequence length {T} exceeds max_len {max_len}")

    k = _choose_k(T, C)
    L = k * C
    rows = T // k

    # Per-lane constants: lane j = t_off*C + ch
    #   a[j] = 10000**(-(2*(ch//2))/C)
    #   b[j] = t_off*a[j] + (0 if ch even else pi/2)     (cos(x) == sin(x + pi/2))
    ch = np.arange(C)
    inv_freq_c = 10000.0 ** (-(2.0 * (ch // 2)) / float(C))
    phase_c = np.where(ch % 2 == 0, 0.0, np.pi / 2.0)
    t_off = np.repeat(np.arange(k), C)
    a = np.tile(inv_freq_c, k)
    b = t_off * a + np.tile(phase_c, k)
    aux = jnp.asarray(np.stack([a, b]).reshape(2, 1, L), dtype=jnp.float32)

    # ~2 MiB per block; tile_rows is a multiple of 8 or the full row extent
    # (satisfies the (8,128) block rule; last dim is always the full extent L).
    itemsize = jnp.dtype(x.dtype).itemsize
    tr = max(1, (2 * 1024 * 1024) // (L * itemsize))
    if tr >= rows:
        tile_rows = rows
    else:
        tile_rows = min(rows, max(8, (tr // 8) * 8))

    x_flat = x.reshape(B, rows, L)                          # free contiguous reshape
    grid = (B, pl.cdiv(rows, tile_rows))

    out = pl.pallas_call(
        functools.partial(_pe_add_kernel, k=k, tile_rows=tile_rows),
        out_shape=jax.ShapeDtypeStruct((B, rows, L), x.dtype),
        grid_spec=pl.GridSpec(
            grid=grid,
            in_specs=[
                pl.BlockSpec((1, tile_rows, L), lambda bi, ri: (bi, ri, 0)),
                pl.BlockSpec((2, 1, L), lambda bi, ri: (0, 0, 0)),   # constant index:
            ],                                                       # fetched once, VMEM-resident
            out_specs=pl.BlockSpec((1, tile_rows, L), lambda bi, ri: (bi, ri, 0)),
        ),
        compiler_params=pltpu.CompilerParams(
            dimension_semantics=("parallel", "parallel"),
        ),
    )(x_flat, aux)
    return out.reshape(B, T, C)


if __name__ == "__main__":
    B, T, C = 2, 8, 32          # (batch, seq, hidden) — C even, as the module implies
    MAX_LEN = 5000

    key = jax.random.PRNGKey(0)
    x = jax.random.normal(key, (B, T, C), dtype=jnp.float32)

    out = positional_encoding_forward(x, max_len=MAX_LEN)
    out = jax.block_until_ready(out)

    emb_table = build_positional_embedding(C, MAX_LEN)
    ref = x + emb_table[None, :T, :]

    assert out.shape == (B, T, C)
    assert jnp.allclose(out, ref, atol=1e-5, rtol=1e-5), float(jnp.max(jnp.abs(out - ref)))
    print("KERNEL_OK")
</pallas_src>

<mosaic_0001>
module attributes {stable_mosaic.version = 11 : i64} {
  func.func @_pe_add_kernel(%arg0: i32, %arg1: i32, %arg2: memref<1x1x256xf32, #tpu.memory_space<vmem>>, %arg3: memref<2x1x256xf32, #tpu.memory_space<vmem>>, %arg4: memref<1x1x256xf32, #tpu.memory_space<vmem>>) attributes {dimension_semantics = [#tpu.dimension_semantics<parallel>, #tpu.dimension_semantics<parallel>], iteration_bounds = array<i64: 2, 1>, scalar_prefetch = 0 : i64, scratch_operands = 0 : i64, tpu.core_type = #tpu.core_type<tc>, window_params = [{transform_indices = @transform_0, window_bounds = array<i64: 1, 1, 256>}, {pipeline_mode = #tpu.pipeline_mode<synchronous>, transform_indices = @transform_1, window_bounds = array<i64: 2, 1, 256>}, {transform_indices = @transform_2, window_bounds = array<i64: 1, 1, 256>}]} {
    %c1_i32 = arith.constant 1 : i32
    %0 = arith.muli %arg1, %c1_i32 : i32
    %1 = tpu.iota {dimensions = array<i32: 1>} : vector<1x1x256xi32>
    %2 = vector.broadcast %0 : i32 to vector<1x1x256xi32>
    %3 = arith.addi %1, %2 : vector<1x1x256xi32>
    %4 = arith.sitofp %3 : vector<1x1x256xi32> to vector<1x1x256xf32>
    %cst = arith.constant 8.000000e+00 : f32
    %5 = vector.broadcast %cst : f32 to vector<1x1x256xf32>
    %6 = arith.mulf %4, %5 : vector<1x1x256xf32>
    %c0 = arith.constant 0 : index
    %c0_0 = arith.constant 0 : index
    %c0_1 = arith.constant 0 : index
    %7 = vector.load %arg3[%c0, %c0_0, %c0_1] : memref<2x1x256xf32, #tpu.memory_space<vmem>>, vector<2x1x256xf32>
    %8 = vector.extract_strided_slice %7 {offsets = [0, 0, 0], sizes = [1, 1, 256], strides = [1, 1, 1]} : vector<2x1x256xf32> to vector<1x1x256xf32>
    %9 = vector.shape_cast %8 : vector<1x1x256xf32> to vector<1x256xf32>
    %10 = vector.extract_strided_slice %7 {offsets = [1, 0, 0], sizes = [1, 1, 256], strides = [1, 1, 1]} : vector<2x1x256xf32> to vector<1x1x256xf32>
    %11 = vector.shape_cast %10 : vector<1x1x256xf32> to vector<1x256xf32>
    %12 = vector.shape_cast %9 : vector<1x256xf32> to vector<1x1x256xf32>
    %13 = arith.mulf %6, %12 : vector<1x1x256xf32>
    %14 = vector.shape_cast %11 : vector<1x256xf32> to vector<1x1x256xf32>
    %15 = arith.addf %13, %14 : vector<1x1x256xf32>
    %16 = math.sin %15 : vector<1x1x256xf32>
    %c0_2 = arith.constant 0 : index
    %c0_3 = arith.constant 0 : index
    %c0_4 = arith.constant 0 : index
    %17 = vector.load %arg2[%c0_2, %c0_3, %c0_4] : memref<1x1x256xf32, #tpu.memory_space<vmem>>, vector<1x1x256xf32>
    %18 = arith.addf %17, %16 : vector<1x1x256xf32>
    %c0_5 = arith.constant 0 : index
    %c0_6 = arith.constant 0 : index
    %c0_7 = arith.constant 0 : index
    %19 = vector.load %arg4[%c0_5, %c0_6, %c0_7] : memref<1x1x256xf32, #tpu.memory_space<vmem>>, vector<1x1x256xf32>
    tpu.vector_store %arg4[%c0_5, %c0_6, %c0_7], %18 {strides = array<i32>} : memref<1x1x256xf32, #tpu.memory_space<vmem>>, vector<1x1x256xf32>,
    return
  }
  func.func @transform_0(%arg0: i32, %arg1: i32) -> (i32, i32, i32) {
    %c0_i32 = arith.constant 0 : i32
    %c0_i32_0 = arith.constant 0 : i32
    return %arg0, %arg1, %c0_i32 : i32, i32, i32
  }
  func.func @transform_1(%arg0: i32, %arg1: i32) -> (i32, i32, i32) {
    %c0_i32 = arith.constant 0 : i32
    %c0_i32_0 = arith.constant 0 : i32
    %c0_i32_1 = arith.constant 0 : i32
    %c0_i32_2 = arith.constant 0 : i32
    return %c0_i32, %c0_i32_0, %c0_i32_1 : i32, i32, i32
  }
  func.func @transform_2(%arg0: i32, %arg1: i32) -> (i32, i32, i32) {
    %c0_i32 = arith.constant 0 : i32
    %c0_i32_0 = arith.constant 0 : i32
    return %arg0, %arg1, %c0_i32 : i32, i32, i32
  }
}

</mosaic_0001>

<bundles_post_ra>
// kernel: tpu_custom_call.1
= control target key start
LH: loop header
LB: loop body
LE: loop exit
PB: predicated region body
PF: predicated region fallthrough
CT: control target
= control target key end

     0   :  { %7 = vsyncpa [#allocation3], 0  ;;  %s1123_s0 = inlined_call_operand.hbm [shape: f32[2,1,256], index: 0, kind: input, shape index: {}]   ;;  %s1124_s1 = inlined_call_operand.hbm [shape: f32[2,1,256], index: 1, kind: input, shape index: {}]   ;;  %s1125_s2 = inlined_call_operand.hbm [shape: f32[2,1,256], index: 2, kind: output, shape index: {}]  }
   0x1   :  { %9 = vsyncpa [#allocation3 + $0x1], 0 }
   0x2   :  { %10 = vsyncpa [#allocation6], 0 }
   0x3   :  { %11 = vsyncpa [#allocation4], 0 }
   0x4   :  { %13 = vsyncpa [#allocation4 + $0x1], 0  ;;  %s863_s9 = smov 0   ;;  %s865_s10 = smov 0  }
   0x5   :  { %s867_s11 = smov 0   ;;  %s869_s12 = smov 0  }
   0x6   :  { %s871_s13 = smov 0   ;;  %s873_s14 = smov 0  }
   0x7 LB: > { %s571_s15 = sadd.s32 4294967295, %s834_s14   ;;  %s572_s16 = sadd.s32 4294967294, %s834_s14   ;;  %s834_s14 = sphi %s873_s14, %s19_s14   ;;  %s830_s13 = sphi %s871_s13, %s1145_s13   ;;  %s826_s12 = sphi %s869_s12, %s1144_s12   ;;  %s822_s11 = sphi %s867_s11, %s1143_s11   ;;  %s818_s10 = sphi %s865_s10, %s1142_s10   ;;  %s814_s9 = sphi %s863_s9, %s1141_s9  }
   0x8   : > { %p53_p0 = scmp.ne.s32.totalorder %s818_s10, %s814_s9  ;;  %p897_p1 = scmp.eq.s32.totalorder %s571_s15, 0 }
   0x9   : > { %p901_p2 = scmp.eq.s32.totalorder %s571_s15, 1  ;;  %p106_p3 = scmp.eq.s32.totalorder %s572_s16, 1 }
   0xa   : > { %p907_p4 = por %p897_p1, %p53_p0  ;;  %p573_p5 = scmp.ge.s32.totalorder %s834_s14, 1 }
   0xb   : > { %p912_p6 = por %p106_p3, %p53_p0  ;;  %p113_p7 = scmp.lt.s32.totalorder %s834_s14, 3 }
   0xc   : > { %s1129_s19 = scalar_select %p907_p4, 1, 0 }
   0xd   : > { %s1130_s20 = scalar_select %p912_p6, 1, 0 }
   0xe   : > { %p917_p8 = pnand %p573_p5, %p113_p7  ;;  %s836_s22 = smov [#allocation5]  }
   0xf   : > { %s125_s23 = sshll.u32 %s836_s22, 4  ;;  %s31_s25 = sadd.s32 1, %s830_s13  ;;  %s126_s23 = int_to_ptr.vmem [resolvable:$true] %s125_s23 }
  0x10   : > { %p614_p9 = pneg %p917_p8  ;;  %s707_s26 = scalar_lea.vmem %s126_s23, 64 }
  0x11   : > { %p708_p13 = scmp.ne.s32.totalorder %s126_s23, %s707_s26  ;;  %p715_p5 = scmp.lt.s32.totalorder %s126_s23, %s126_s23 }
  0x12   : > { %p926_p11 = pnand %p614_p9, %p897_p1  ;;  %p716_p7 = scmp.lt.s32.totalorder %s707_s26, %s707_s26 }
  0x14   : > { %p698_p12 = pneg %p926_p11  ;;  %p717_p6 = por %p716_p7, %p715_p5 }
  0x16   : > { %p710_p0 = pnand %p708_p13, %p698_p12 }
  0x18   : > { %p711_p3 = pneg %p710_p0 }
  0x1a   : > { %p718_p4 = pnand %p717_p6, %p711_p3 }
  0x1c   : > { %721 = shalt.err (!%p718_p4)
}
  0x1d   : > { %s837_s27 = smov 32   ;;  %s838_s28 = smov 2  }
  0x1e   : > { %617 = dma.hbm_to_vmem [thread:$0]  (!%p926_p11), %s1124_s1, 64, %s126_s23, [#allocation6], %s837_s27, %s837_s27, %s838_s28  }
  0x1f   : > { %p33_p6 = scmp.ge.s32.totalorder %s31_s25, 2  ;;  %s40_s3 = sadd.s32 1, %s822_s11 }
  0x20   : > { %p47_p4 = scmp.ne.s32.totalorder %s822_s11, %s818_s10  ;;  %p48_p9 = scmp.eq.s32.totalorder %s834_s14, 0 }
  0x21   : > { %s1147_s25 = smov (%p33_p6, %s31_s25), 0  ;;  %p627_p0 = scmp.lt.s32.totalorder %s834_s14, 2 }
  0x22   : > { %p944_p12 = por %p48_p9, %p47_p4  ;;  %p950_p13 = por %p901_p2, %p47_p4 }
  0x23   : > { %s35_s6 = ssub.s32 %s830_s13, %s1147_s25  ;;  %s139_s7 = sand.u32 1, %s822_s11  }
  0x24   : > { %p38_p11 = scmp.eq.s32.totalorder %s35_s6, 0  ;;  %s576_s8 = sshll.u32 %s139_s7, 1 }
  0x25   : > { %s596_s16 = sshll.u32 %s830_s13, 5  ;;  %s143_s26 = scalar_lea.vmem [#allocation2], %s576_s8 }
  0x26   : > { %s959_s15 = scalar_select %p38_p11, %s822_s11, %s40_s3  }
  0x27   : > { %s151_s24 = scalar_lea.hbm %s1123_s0, %s596_s16  ;;  %s153_s27 = sshll.u32 %s143_s26, 4  ;;  %s154_s27 = int_to_ptr.vmem [resolvable:$true] %s153_s27 }
  0x28   : > { %p967_p2 = pnand %p627_p0, %p944_p12  ;;  %s140_s28 = scalar_lea.sflag [#allocation3], %s139_s7 }
  0x29   : > { %s735_s29 = scalar_lea.vmem %s154_s27, 32  ;;  %s839_s30 = smov [#allocation2]  }
  0x2a   : > { %p724_p3 = pneg %p967_p2  ;;  %p736_p5 = scmp.ne.s32.totalorder %s154_s27, %s735_s29 }
  0x2b   : > { %s740_s3 = sshll.u32 %s839_s30, 4  ;;  %s741_s3 = int_to_ptr.vmem [resolvable:$false] %s740_s3 }
  0x2c   : > { %p738_p7 = pnand %p736_p5, %p724_p3  ;;  %s742_s6 = scalar_lea.vmem %s741_s3, 64 }
  0x2d   : > { %p743_p4 = scmp.lt.s32.totalorder %s154_s27, %s741_s3  ;;  %p744_p9 = scmp.lt.s32.totalorder %s742_s6, %s735_s29 }
  0x2e   : > { %p739_p6 = pneg %p738_p7 }
  0x2f   : > { %p745_p11 = por %p744_p9, %p743_p4 }
  0x31   : > { %p746_p10 = pnand %p745_p11, %p739_p6 }
  0x33   : > { %749 = shalt.err (!%p746_p10)
}
  0x34   : > { %621 = dma.hbm_to_vmem [thread:$0]  (!%p967_p2), %s151_s24, 32, %s154_s27, %s140_s28  }
  0x35   : > { %162 = sbr.rel (%p917_p8) target bundleno = 186 (0xba), region = 28  ;;  %s978_s4 = sand.u32 (!%p917_p8), 1, %s818_s10  }
  0x36   : > { %s580_s7 = sshll.u32 (!%p917_p8), %s978_s4, 1  ;;  %s165_s8 = scalar_lea.sflag (!%p917_p8), [#allocation3], %s978_s4 }
  0x37   : > { %s984_s16 = scalar_lea.vmem (!%p917_p8), [#allocation2], %s580_s7  ;;  %p1136_p12 = scmp.ne.s32.totalorder (!%p917_p8), %s1129_s19, 0 }
  0x3a   : > { %801 = dma.done.wait (%p1136_p12), %s165_s8, 32  }
  0x3b   : > { %803 = vsyncadd (%p1136_p12), %s165_s8, 4294967264 }
  0x3c   : > { %805 = dma.done.wait (%p897_p1), [#allocation6], 64  }
  0x3d   : > { %807 = vsyncadd (%p897_p1), [#allocation6], 4294967232  ;;  %v193_v0 = vlaneseq  ;;  %v199_v6 = vld [vmem:[#allocation5] sm:$0x3]  ;;  %v200_v7 = vld [vmem:[#allocation5 + $0x2] sm:$0x3] }
  0x3e   : > { %v840_v38 = vmov 683565275   ;;  %v841_v40 = vmov 2475754826   ;;  %v842_v42 = vmov 2131351028  }
  0x3f   : > { %v995_v1 = vshrl.u32 %v193_v0, 7  ;;  %v843_v44 = vmov 2102212464   ;;  %v844_v46 = vmov 920167782   ;;  %s597_s17 = sshll.u32 %s826_s12, 5 }
  0x40   : > { %v845_v54 = vmov 1326507024   ;;  %s192_s19 = scalar_lea.vmem [#allocation7], %s580_s7  ;;  %s475_s24 = scalar_lea.hbm %s1125_s2, %s597_s17 }
  0x41   : > { %v197_v2 = vcvt.s32.f32 %v995_v1  ;;  %v204_v3 = vsub.s32 0, %v995_v1  ;;  %v208_v4 = vsub.s32 1, %v995_v1  ;;  %s477_s21 = sshll.u32 %s192_s19, 4  ;;  %s461_s26 = scalar_lea.sflag [#allocation4], %s978_s4  ;;  %s478_s21 = int_to_ptr.vmem [resolvable:$true] %s477_s21 }
  0x42   : > { %s750_s27 = scalar_lea.vmem %s478_s21, 32  ;;  %s847_s12 = smov [#allocation7]  }
  0x43   : > { %v198_v5 = vmul.f32 8.0, %v197_v2  ;;  %v205_v8 = vrot.slane %v199_v6, %v204_v3  ;;  %v209_v9 = vrot.slane %v199_v6, %v208_v4  ;;  %v218_v10 = vrot.slane %v200_v7, %v204_v3  ;;  %p751_p1 = scmp.ne.s32.totalorder %s478_s21, %s750_s27  ;;  %s754_s18 = sshll.u32 %s847_s12, 4  ;;  %s755_s18 = int_to_ptr.vmem [resolvable:$false] %s754_s18 }
  0x44   : > { %v222_v11 = vrot.slane %v200_v7, %v208_v4  ;;  %s756_s28 = scalar_lea.vmem %s755_s18, 64  ;;  %p757_p0 = scmp.lt.s32.totalorder %s478_s21, %s755_s18 }
  0x45   : > { %v212_v12 = vmul.f32 %v205_v8, %v198_v5  ;;  %v213_v13 = vmul.f32 %v209_v9, %v198_v5  ;;  %p752_p8 = pnand %p751_p1, %p950_p13  ;;  %p758_p2 = scmp.lt.s32.totalorder %s756_s28, %s750_s27 }
  0x47   : > { %v1000_v14 = vadd.f32 %v218_v10, %v212_v12  ;;  %v1002_v15 = vadd.f32 %v222_v11, %v213_v13  ;;  %p753_p10 = pneg %p752_p8  ;;  %p759_p3 = por %p758_p2, %p757_p0 }
  0x49   : > { %v227_v16 = vand.u32 2147483647, %v1000_v14  ;;  %v230_v17 = vand.u32 2139095040, %v1000_v14  ;;  %v331_v18 = vand.u32 2147483647, %v1002_v15  ;;  %v334_v19 = vand.u32 2139095040, %v1002_v15  ;;  %p760_p5 = pnand %p759_p3, %p753_p10 }
  0x4a   : > { %vm229_vm14 = vcmp.lt.s32.totalorder %v1000_v14, 0 }
  0x4b   : > { %v231_v20 = vshrl.u32 %v230_v17, 23  ;;  %v234_v21 = vand.u32 8388607, %v227_v16  ;;  %v335_v22 = vshrl.u32 %v334_v19, 23  ;;  %v338_v23 = vand.u32 8388607, %v331_v18 }
  0x4c   : > { %vm1063_vm15 = vcmp.le.f32.partialorder %v227_v16, 0.7853982 }
  0x4d   : > { %v583_v24 = vadd.s32 4294967169, %v231_v20  ;;  %v587_v25 = vadd.s32 4294967169, %v335_v22  ;;  %v235_v27 = vor.u32 8388608, %v234_v21  ;;  %v339_v28 = vor.u32 8388608, %v338_v23 }
  0x4f   : > { %v237_v26 = vadd.s32 1, %v583_v24  ;;  %v341_v29 = vadd.s32 1, %v587_v25  ;;  %v1012_v34 = vshll.u32 %v235_v27, 8  ;;  %v1014_v36 = vshll.u32 %v339_v28, 8 }
  0x51   : > { %vm238_vm0 = vcmp.gt.s32.totalorder %v237_v26, 0  ;;  %vm342_vm1 = vcmp.gt.s32.totalorder %v341_v29, 0 }
  0x52   : > { %v239_v30 = vsel %vm238_vm0, %v237_v26, 0  ;;  %v343_v33 = vsel %vm342_vm1, %v341_v29, 0  ;;  %vm333_vm0 = vcmp.lt.s32.totalorder %v1002_v15, 0  ;;  %vm332_vm1 = vcmp.le.f32.partialorder %v331_v18, 0.7853982 }
  0x53   : > { %v240_v31 = vshrl.u32 %v239_v30, 5  ;;  %v241_v32 = vand.u32 31, %v239_v30  ;;  %v345_v35 = vand.u32 31, %v343_v33  ;;  %v1016_v48 = vshrl.u32 %v343_v33, 5 }
  0x55   : > { %v242_v37 = vsub.s32 32, %v241_v32  ;;  %v244_v39 = vshll.u32 %v840_v38, %v241_v32  ;;  %v247_v41 = vshll.u32 %v841_v40, %v241_v32  ;;  %v250_v43 = vshll.u32 %v842_v42, %v241_v32 }
  0x56   : > { %v253_v45 = vshll.u32 %v843_v44, %v241_v32  ;;  %v256_v47 = vshll.u32 %v844_v46, %v241_v32  ;;  %vm259_vm2 = vcmp.lt.s32.totalorder %v240_v31, 1  ;;  %vm260_vm3 = vcmp.lt.s32.totalorder %v240_v31, 2 }
  0x57   : > { %v243_v49 = vshrl.u32 %v840_v38, %v242_v37  ;;  %v245_v50 = vshrl.u32 %v841_v40, %v242_v37  ;;  %v248_v51 = vshrl.u32 %v842_v42, %v242_v37  ;;  %v251_v52 = vshrl.u32 %v843_v44, %v242_v37 }
  0x58   : > { %v254_v53 = vshrl.u32 %v844_v46, %v242_v37  ;;  %v257_v55 = vshrl.u32 %v845_v54, %v242_v37  ;;  %vm262_vm4 = vcmp.lt.s32.totalorder %v240_v31, 4  ;;  %v346_v59 = vsub.s32 32, %v345_v35 }
  0x59   : > { %v246_v56 = vor.u32 %v245_v50, %v244_v39  ;;  %v249_v57 = vor.u32 %v248_v51, %v247_v41  ;;  %v252_v58 = vor.u32 %v251_v52, %v250_v43  ;;  %vm261_vm5 = vcmp.lt.s32.totalorder %v240_v31, 3 }
  0x5a   : > { %v255_v60 = vor.u32 %v254_v53, %v253_v45  ;;  %v258_v61 = vor.u32 %v257_v55, %v256_v47  ;;  %v348_v62 = vshll.u32 %v840_v38, %v345_v35  ;;  %v351_v8 = vshll.u32 %v841_v40, %v345_v35 }
  0x5b   : > { %v263_v63 = vsel %vm259_vm2, %v243_v49, %v246_v56  ;;  %v264_v2 = vsel %vm262_vm4, %v252_v58, 2102212464  ;;  %v267_v3 = vsel %vm259_vm2, %v246_v56, %v249_v57  ;;  %v271_v4 = vsel %vm259_vm2, %v249_v57, %v252_v58 }
  0x5c   : > { %v265_v5 = vsel %vm261_vm5, %v249_v57, %v264_v2  ;;  %v268_v6 = vsel %vm262_vm4, %v255_v60, 920167782  ;;  %v272_v7 = vsel %vm262_vm4, %v258_v61, 1326507024  ;;  %v347_v11 = vshrl.u32 %v840_v38, %v346_v59 }
  0x5d   : > { %v269_v9 = vsel %vm261_vm5, %v252_v58, %v268_v6  ;;  %v273_v10 = vsel %vm261_vm5, %v255_v60, %v272_v7  ;;  %v349_v12 = vshrl.u32 %v841_v40, %v346_v59  ;;  %v266_v13 = vsel %vm260_vm3, %v263_v63, %v265_v5 }
  0x5e   : > { %v270_v17 = vsel %vm260_vm3, %v267_v3, %v269_v9  ;;  %v274_v19 = vsel %vm260_vm3, %v271_v4, %v273_v10  ;;  %v352_v20 = vshrl.u32 %v842_v42, %v346_v59  ;;  %v354_v27 = vshll.u32 %v842_v42, %v345_v35 }
  0x5f   : > { %v1025_v21 = vmul.u32.u64.low %v1012_v34, %v274_v19  ;;  %v1026_v22 = vmul.u32.u64.high %v1012_v34, %v274_v19, %v1025_v21  ;;  %v1029_v23 = vmul.u32.u64.low %v1012_v34, %v270_v17  ;;  %v1030_v24 = vmul.u32.u64.high %v1012_v34, %v270_v17, %v1029_v23 }
  0x60   : > { %v350_v25 = vor.u32 %v349_v12, %v348_v62  ;;  %v353_v26 = vor.u32 %v352_v20, %v351_v8  ;;  %v355_v28 = vshrl.u32 %v843_v44, %v346_v59  ;;  %v357_v29 = vshll.u32 %v843_v44, %v345_v35 }
  0x61   : > { %v358_v30 = vshrl.u32 %v844_v46, %v346_v59  ;;  %v360_v32 = vshll.u32 %v844_v46, %v345_v35  ;;  %v361_v33 = vshrl.u32 %v845_v54, %v346_v59  ;;  %v282_v31 = vmul.u32 %v1012_v34, %v266_v13 }
  0x62   : > { %v356_v37 = vor.u32 %v355_v28, %v354_v27  ;;  %vm363_vm6 = vcmp.lt.s32.totalorder %v1016_v48, 1  ;;  %vm364_vm7 = vcmp.lt.s32.totalorder %v1016_v48, 2  ;;  %vm284_vm8 = vc.u32 %v1026_v22, %v1029_v23 }
  0x63   : > { %v285_v38 = vadd.s32 1, %v1030_v24  ;;  %v359_v39 = vor.u32 %v358_v30, %v357_v29  ;;  %vm365_vm9 = vcmp.lt.s32.totalorder %v1016_v48, 3  ;;  %v362_v40 = vor.u32 %v361_v33, %v360_v32 }
  0x64   : > { %vm366_vm10 = vcmp.lt.s32.totalorder %v1016_v48, 4  ;;  %v367_v41 = vsel %vm363_vm6, %v347_v11, %v350_v25  ;;  %v371_v35 = vsel %vm363_vm6, %v350_v25, %v353_v26  ;;  %v375_v44 = vsel %vm363_vm6, %v353_v26, %v356_v37 }
  0x65   : > { %v286_v42 = vsel %vm284_vm8, %v285_v38, %v1030_v24  ;;  %v368_v34 = vsel %vm366_vm10, %v356_v37, 2102212464  ;;  %v372_v43 = vsel %vm366_vm10, %v359_v39, 920167782  ;;  %v376_v49 = vsel %vm366_vm10, %v362_v40, 1326507024 }
  0x66   : > { %v287_v45 = vadd.s32 %v286_v42, %v282_v31  ;;  %v369_v46 = vsel %vm365_vm9, %v353_v26, %v368_v34  ;;  %v373_v47 = vsel %vm365_vm9, %v356_v37, %v372_v43  ;;  %v377_v52 = vsel %vm365_vm9, %v359_v39, %v376_v49 }
  0x67   : > { %v370_v50 = vsel %vm364_vm7, %v367_v41, %v369_v46  ;;  %v374_v51 = vsel %vm364_vm7, %v371_v35, %v373_v47  ;;  %v378_v54 = vsel %vm364_vm7, %v375_v44, %v377_v52  ;;  %v283_v11 = vadd.s32 %v1029_v23, %v1026_v22 }
  0x68   : > { %v288_v53 = vadd.s32 536870912, %v287_v45  ;;  %v1047_v55 = vmul.u32.u64.low %v1014_v36, %v374_v51  ;;  %v1048_v56 = vmul.u32.u64.high %v1014_v36, %v374_v51, %v1047_v55  ;;  %v386_v60 = vmul.u32 %v1014_v36, %v370_v50 }
  0x69   : > { %v1051_v57 = vmul.u32.u64.low %v1014_v36, %v378_v54  ;;  %v1052_v58 = vmul.u32.u64.high %v1014_v36, %v378_v54, %v1051_v57  ;;  %vm319_vm6 = vweird.f32 %v1000_v14  ;;  %vm423_vm9 = vweird.f32 %v1002_v15 }
  0x6a   : > { %v289_v59 = vshrl.u32 %v288_v53, 30  ;;  %v389_v62 = vadd.s32 1, %v1048_v56  ;;  %vm457_vm10 = vcmp.lt.s32.totalorder %v193_v0, 256 }
  0x6b   : > { %vm388_vm11 = vc.u32 %v1052_v58, %v1047_v55  ;;  %v387_v32 = vadd.s32 %v1047_v55, %v1052_v58 }
  0x6c   : > { %v290_v61 = vshll.u32 %v289_v59, 30  ;;  %v390_v48 = vsel %vm388_vm11, %v389_v62, %v1048_v56  ;;  %v313_v44 = vsub.s32 4, %v289_v59 }
  0x6d   : > { %v391_v2 = vadd.s32 %v390_v48, %v386_v60 }
  0x6e   : > { %v291_v63 = vsub.s32 %v287_v45, %v290_v61  ;;  %v314_v50 = vsel %vm229_vm14, %v313_v44, %v289_v59 }
  0x6f   : > { %v392_v4 = vadd.s32 536870912, %v391_v2  ;;  %v316_v53 = vsel %vm1063_vm15, 0, %v314_v50 }
  0x70   : > { %v293_v3 = vsub.s32 0, %v291_v63  ;;  %v320_v57 = vadd.s32 3, %v316_v53 }
  0x71   : > { %v393_v6 = vshrl.u32 %v392_v4, 30 }
  0x72   : > { %v584_v5 = vmin.u32 %v293_v3, %v291_v63  ;;  %v321_v60 = vand.u32 3, %v320_v57 }
  0x73   : > { %v394_v8 = vshll.u32 %v393_v6, 30  ;;  %v417_v16 = vsub.s32 4, %v393_v6 }
  0x74   : > { %v295_v7 = vclz %v584_v5  ;;  %vm323_vm2 = vcmp.eq.s32.totalorder %v321_v60, 0  ;;  %vm326_vm3 = vcmp.eq.s32.totalorder %v321_v60, 2  ;;  %vm322_vm4 = vcmp.lt.s32.totalorder %v321_v60, 2 }
  0x75   : > { %v395_v10 = vsub.s32 %v391_v2, %v394_v8  ;;  %v418_v55 = vsel %vm333_vm0, %v417_v16, %v393_v6  ;;  %v846_v2 = vmov 1966171168  }
  0x76   : > { %v585_v9 = vadd.s32 4294967294, %v295_v7  ;;  %v420_v58 = vsel %vm332_vm1, 0, %v418_v55  ;;  %v440_v3 = vunpack.c.l.s4 %v846_v2 }
  0x77   : > { %v397_v12 = vsub.s32 0, %v395_v10  ;;  %v424_v62 = vadd.s32 3, %v420_v58 }
  0x78   : > { %vm586_vm12 = vcmp.lt.s32.totalorder %v585_v9, 0  ;;  %v441_v7 = vunpack.c.0.s8 %v440_v3 }
  0x79   : > { %v298_v36 = vsel %vm586_vm12, 0, %v585_v9  ;;  %v588_v20 = vmin.u32 %v397_v12, %v395_v10  ;;  %v425_v18 = vand.u32 3, %v424_v62 }
  0x7a   : > { %v299_v13 = vsub.s32 32, %v298_v36  ;;  %v300_v17 = vshll.u32 %v291_v63, %v298_v36  ;;  %v303_v19 = vsub.s32 4294967266, %v298_v36 }
  0x7b   : > { %v399_v25 = vclz %v588_v20  ;;  %vm430_vm5 = vcmp.eq.s32.totalorder %v425_v18, 2  ;;  %vm427_vm7 = vcmp.eq.s32.totalorder %v425_v18, 0  ;;  %vm426_vm8 = vcmp.lt.s32.totalorder %v425_v18, 2 }
  0x7c   : > { %v301_v21 = vshrl.u32 %v283_v11, %v299_v13  ;;  %v304_v24 = vadd.s32 127, %v303_v19  ;;  %v444_v19 = vsub.s32 %v441_v7, %v995_v1 }
  0x7d   : > { %v589_v28 = vadd.s32 4294967294, %v399_v25 }
  0x7e   : > { %v302_v26 = vor.u32 %v301_v21, %v300_v17  ;;  %v305_v27 = vshll.u32 %v304_v24, 23  ;;  %v435_v24 = vld [vmem:[%s984_s16] sm:$0x3] }
  0x7f   : > { %vm590_vm13 = vcmp.lt.s32.totalorder %v589_v28, 0 }
  0x80   : > { %v306_v29 = vor.u32 4788187, %v305_v27  ;;  %v309_v30 = vcvt.s32.f32 %v302_v26  ;;  %v402_v22 = vsel %vm590_vm13, 0, %v589_v28 }
  0x81   : > { %v403_v23 = vsub.s32 32, %v402_v22  ;;  %v404_v31 = vshll.u32 %v395_v10, %v402_v22  ;;  %v407_v37 = vsub.s32 4294967266, %v402_v22 }
  0x82   : > { %v307_v33 = vand.u32 2147483647, %v306_v29 }
  0x83   : > { %v405_v39 = vshrl.u32 %v387_v32, %v403_v23  ;;  %v408_v40 = vadd.s32 127, %v407_v37 }
  0x84   : > { %v310_v38 = vmul.f32 %v309_v30, %v307_v33 }
  0x85   : > { %v406_v42 = vor.u32 %v405_v39, %v404_v31  ;;  %v409_v34 = vshll.u32 %v408_v40, 23 }
  0x86   : > { %v311_v35 = vxor.u32 2147483648, %v310_v38 }
  0x87   : > { %v410_v46 = vor.u32 4788187, %v409_v34  ;;  %v413_v47 = vcvt.s32.f32 %v406_v42 }
  0x88   : > { %v312_v43 = vsel %vm229_vm14, %v311_v35, %v310_v38 }
  0x89   : > { %v315_v45 = vsel %vm1063_vm15, %v1000_v14, %v312_v43  ;;  %v411_v49 = vand.u32 2147483647, %v410_v46 }
  0x8a   : > { %688 = vcosq.f32 %v315_v45 }
  0x8b   : > { %690 = vsinq.f32 %v315_v45  ;;  %v414_v51 = vmul.f32 %v413_v47, %v411_v49 }
  0x8d   : > { %v415_v52 = vxor.u32 2147483648, %v414_v51 }
  0x8f   : > { %v416_v54 = vsel %vm333_vm0, %v415_v52, %v414_v51 }
  0x90   : > { %v419_v56 = vsel %vm332_vm1, %v1002_v15, %v416_v54 }
  0x91   : > { %692 = vcosq.f32 %v419_v56 }
  0x92   : > { %694 = vsinq.f32 %v419_v56 }
  0x97   : > { %v689_v59 = vpop.eup %688 }
  0x98   : > { %v691_v61 = vpop.eup %690  ;;  %v327_v48 = vxor.u32 2147483648, %v689_v59 }
  0x99   : > { %v324_v63 = vxor.u32 2147483648, %v691_v61 }
  0x9a   : > { %v328_v5 = vsel %vm326_vm3, %v327_v48, %v691_v61 }
  0x9b   : > { %v325_v4 = vsel %vm323_vm2, %v689_v59, %v324_v63 }
  0x9c   : > { %v329_v9 = vsel %vm322_vm4, %v325_v4, %v328_v5 }
  0x9d   : > { %v330_v12 = vsel %vm319_vm6, nan, %v329_v9 }
  0x9e   : > { %v693_v6 = vpop.eup %692 }
  0x9f   : > { %v695_v8 = vpop.eup %694  ;;  %v431_v10 = vxor.u32 2147483648, %v693_v6 }
  0xa0   : > { %v428_v11 = vxor.u32 2147483648, %v695_v8 }
  0xa1   : > { %v432_v36 = vsel %vm430_vm5, %v431_v10, %v695_v8 }
  0xa2   : > { %v429_v13 = vsel %vm427_vm7, %v693_v6, %v428_v11 }
  0xa3   : > { %v433_v17 = vsel %vm426_vm8, %v429_v13, %v432_v36 }
  0xa4   : > { %v434_v20 = vsel %vm423_vm9, nan, %v433_v17 }
  0xa5   : > { %v438_v21 = vcombine.low %v330_v12, %v434_v20 }
  0xa7   : > { %v445_v14 = vrot.slane %v438_v21, %v444_v19 }
  0xa9   : > { %v452_v25 = vrot.slane %v445_v14, %v444_v19 }
  0xab   : > { %v454_v15 = vadd.f32 %v452_v25, %v435_v24 }
  0xad   : > { %459 = vst.msk [vmem:[%s192_s19] sm:$0x3] %vm457_vm10, %v454_v15 }
  0xae   : > { %763 = shalt.err (!%p760_p5)
}
  0xaf   : > { %s764_s29 = scalar_lea.hbm %s475_s24, 32  ;;  %s768_s6 = scalar_lea.hbm %s1125_s2, 64 }
  0xb0   : > { %p765_p7 = scmp.ne.s32.totalorder %s475_s24, %s764_s29  ;;  %p769_p9 = scmp.lt.s32.totalorder %s475_s24, %s1125_s2 }
  0xb1   : > { %p770_p11 = scmp.lt.s32.totalorder %s768_s6, %s764_s29 }
  0xb2   : > { %p766_p6 = pnand %p765_p7, %p950_p13 }
  0xb3   : > { %p771_p12 = por %p770_p11, %p769_p9 }
  0xb4   : > { %p767_p4 = pneg %p766_p6 }
  0xb6   : > { %p772_p1 = pnand %p771_p12, %p767_p4 }
  0xb8   : > { %775 = shalt.err (!%p772_p1)
}
  0xb9   : > { %612 = dma.vmem_to_hbm [thread:$0]  (%p950_p13), %s478_s21, 32, %s475_s24, %s461_s26  }
  0xba PF: > { %s489_s8 = sand.u32 1, %s814_s9   ;;  %p1139_p8 = scmp.ne.s32.totalorder %s1130_s20, 0 }
  0xbb   : > { %p1140_p10 = scmp.ge.s32.totalorder %s834_s14, 2  ;;  %s490_s16 = scalar_lea.sflag [#allocation4], %s489_s8 }
  0xbd   : > { %p623_p0 = pnand %p1140_p10, %p1139_p8 }
  0xbf   : > { %p624_p2 = pneg %p623_p0 }
  0xc1   : > { %809 = dma.done.wait (%p624_p2), %s490_s16, 32  }
  0xc2   : > { %811 = vsyncadd (%p624_p2), %s490_s16, 4294967264  ;;  %s19_s14 = sadd.s32 1, %s834_s14   ;;  %s1141_s9 = smov %s818_s10 }
  0xc3   : > { %p16_p3 = scmp.ge.s32.totalorder %s19_s14, 4   ;;  %s1142_s10 = smov %s822_s11 }
  0xc4   : > { %s1143_s11 = smov %s959_s15  ;;  %s1144_s12 = smov %s830_s13 }
  0xc5   : > { %s1145_s13 = smov %s1147_s25  ;;  %18 = sbr.rel (!%p16_p3) target bundleno = 7 (0x7), region = 77 }
  0xca   :  { %495 = vsyncpa [#allocation3], 1 }
  0xcb   :  { %497 = vsyncpa [#allocation3 + $0x1], 1 }
  0xcc   :  { %498 = vsyncpa [#allocation6], 1 }
  0xcd   :  { %499 = vsyncpa [#allocation4], 1 }
  0xce   :  { %501 = vsyncpa [#allocation4 + $0x1], 1 }

</bundles_post_ra>
